<compile_context>
chip_gen: v7x
topology: tpu7x:2x2x1
jax: 0.10.0
libtpu: 0.0.40
codegen_flags: <defaults>
</compile_context>

<pallas_src>
import jax
import jax.numpy as jnp
from jax.experimental import pallas as pl
from jax.experimental.pallas import tpu as pltpu


def _linear_kernel(x_ref, w_ref, b_ref, o_ref):
    # VPU broadcast FMA: [C,1] * [1,T] + [C,1] -> [C,T]; no MXU involved.
    o_ref[...] = (w_ref[...] * x_ref[...] + b_ref[...]).astype(o_ref.dtype)


def _round_up(x, m):
    return ((x + m - 1) // m) * m


def multi_class_forward(x, weight, bias, tile_n=1024):
    """x: [N, 1] f32, weight: [num_classes, 1] (PyTorch layout), bias: [num_classes]."""
    n, in_f = x.shape
    assert in_f == 1, "MultiClassExample uses nn.Linear(1, num_classes)"
    c = weight.shape[0]
    orig_dtype = x.dtype

    # Lane-dense relayout: N on the lane (last) axis everywhere.
    x_row = x.reshape(1, n).astype(jnp.float32)     # [1, N]
    w_col = weight.reshape(c, 1).astype(jnp.float32)  # [C, 1]
    b_col = bias.reshape(c, 1).astype(jnp.float32)    # [C, 1]

    # Tile the lane axis: multiple of 128, up to tile_n columns per block.
    tile = min(tile_n, _round_up(n, 128))
    n_pad = _round_up(n, tile)
    if n_pad != n:
        x_row = jnp.pad(x_row, ((0, 0), (0, n_pad - n)))

    grid = (n_pad // tile,)

    out_t = pl.pallas_call(
        _linear_kernel,
        out_shape=jax.ShapeDtypeStruct((c, n_pad), jnp.float32),
        grid=grid,
        in_specs=[
            # Streamed: one lane-dense x tile per grid step.
            pl.BlockSpec((1, tile), lambda i: (0, i)),
            # Tiny constants, resident across all grid steps.
            pl.BlockSpec((c, 1), lambda i: (0, 0)),
            pl.BlockSpec((c, 1), lambda i: (0, 0)),
        ],
        out_specs=pl.BlockSpec((c, tile), lambda i: (0, i)),
        compiler_params=pltpu.CompilerParams(
            # Embarrassingly parallel over the batch tiles -> v7x megacore can
            # shard it; no-op on v5e/v6e.
            dimension_semantics=("parallel",)),
        cost_estimate=pl.CostEstimate(
            flops=2 * n_pad * c,
            transcendentals=0,
            bytes_accessed=4 * (n_pad + 2 * c + c * n_pad)),
    )(x_row, w_col, b_col)

    # Drop padding and return PyTorch layout [N, C].
    return out_t[:, :n].T.astype(orig_dtype)


if __name__ == "__main__":
    key = jax.random.PRNGKey(0)
    k_x, k_w, k_b, k_x2 = jax.random.split(key, 4)

    num_classes = 4
    in_features = 1
    batch = 8

    # Deterministic parameter init (mimics nn.Linear uniform(-1/sqrt(in), 1/sqrt(in))).
    bound = 1.0 / (in_features ** 0.5)
    weight = jax.random.uniform(k_w, (num_classes, in_features),
                                minval=-bound, maxval=bound, dtype=jnp.float32)
    bias = jax.random.uniform(k_b, (num_classes,),
                              minval=-bound, maxval=bound, dtype=jnp.float32)

    # Small shape consistent with the module.
    x = jax.random.normal(k_x, (batch, in_features), dtype=jnp.float32)
    out = jax.block_until_ready(multi_class_forward(x, weight, bias))
    ref = x @ weight.T + bias
    assert out.shape == (batch, num_classes)
    assert jnp.allclose(out, ref, atol=1e-5, rtol=1e-5)

    # Larger batch to exercise lane padding + multi-step grid pipelining.
    x_big = jax.random.normal(k_x2, (2000, in_features), dtype=jnp.float32)
    out_big = jax.block_until_ready(multi_class_forward(x_big, weight, bias))
    ref_big = x_big @ weight.T + bias
    assert out_big.shape == (2000, num_classes)
    assert jnp.allclose(out_big, ref_big, atol=1e-5, rtol=1e-5)

    print("KERNEL_OK")
</pallas_src>

<mosaic_0001>
module attributes {stable_mosaic.version = 11 : i64} {
  func.func @_linear_kernel(%arg0: i32, %arg1: memref<1x128xf32, #tpu.memory_space<vmem>>, %arg2: memref<4x1xf32, #tpu.memory_space<vmem>>, %arg3: memref<4x1xf32, #tpu.memory_space<vmem>>, %arg4: memref<4x128xf32, #tpu.memory_space<vmem>>) attributes {dimension_semantics = [#tpu.dimension_semantics<parallel>], iteration_bounds = array<i64: 1>, scalar_prefetch = 0 : i64, scratch_operands = 0 : i64, tpu.core_type = #tpu.core_type<tc>, window_params = [{transform_indices = @transform_0, window_bounds = array<i64: 1, 128>}, {pipeline_mode = #tpu.pipeline_mode<synchronous>, transform_indices = @transform_1, window_bounds = array<i64: 4, 1>}, {pipeline_mode = #tpu.pipeline_mode<synchronous>, transform_indices = @transform_2, window_bounds = array<i64: 4, 1>}, {transform_indices = @transform_3, window_bounds = array<i64: 4, 128>}]} {
    %c0 = arith.constant 0 : index
    %c0_0 = arith.constant 0 : index
    %0 = vector.load %arg2[%c0, %c0_0] : memref<4x1xf32, #tpu.memory_space<vmem>>, vector<4x1xf32>
    %c0_1 = arith.constant 0 : index
    %c0_2 = arith.constant 0 : index
    %1 = vector.load %arg1[%c0_1, %c0_2] : memref<1x128xf32, #tpu.memory_space<vmem>>, vector<1x128xf32>
    %2 = vector.broadcast %0 : vector<4x1xf32> to vector<4x128xf32>
    %3 = vector.broadcast %1 : vector<1x128xf32> to vector<4x128xf32>
    %4 = arith.mulf %2, %3 : vector<4x128xf32>
    %c0_3 = arith.constant 0 : index
    %c0_4 = arith.constant 0 : index
    %5 = vector.load %arg3[%c0_3, %c0_4] : memref<4x1xf32, #tpu.memory_space<vmem>>, vector<4x1xf32>
    %6 = vector.broadcast %5 : vector<4x1xf32> to vector<4x128xf32>
    %7 = arith.addf %4, %6 : vector<4x128xf32>
    %c0_5 = arith.constant 0 : index
    %c0_6 = arith.constant 0 : index
    %8 = vector.load %arg4[%c0_5, %c0_6] : memref<4x128xf32, #tpu.memory_space<vmem>>, vector<4x128xf32>
    tpu.vector_store %arg4[%c0_5, %c0_6], %7 {strides = array<i32>} : memref<4x128xf32, #tpu.memory_space<vmem>>, vector<4x128xf32>,
    return
  }
  func.func @transform_0(%arg0: i32) -> (i32, i32) {
    %c0_i32 = arith.constant 0 : i32
    %c0_i32_0 = arith.constant 0 : i32
    return %c0_i32, %arg0 : i32, i32
  }
  func.func @transform_1(%arg0: i32) -> (i32, i32) {
    %c0_i32 = arith.constant 0 : i32
    %c0_i32_0 = arith.constant 0 : i32
    %c0_i32_1 = arith.constant 0 : i32
    return %c0_i32, %c0_i32_0 : i32, i32
  }
  func.func @transform_2(%arg0: i32) -> (i32, i32) {
    %c0_i32 = arith.constant 0 : i32
    %c0_i32_0 = arith.constant 0 : i32
    %c0_i32_1 = arith.constant 0 : i32
    return %c0_i32, %c0_i32_0 : i32, i32
  }
  func.func @transform_3(%arg0: i32) -> (i32, i32) {
    %c0_i32 = arith.constant 0 : i32
    %c0_i32_0 = arith.constant 0 : i32
    return %c0_i32, %arg0 : i32, i32
  }
}

</mosaic_0001>

<bundles_post_ra>
// kernel: tpu_custom_call.1
= control target key start
LH: loop header
LB: loop body
LE: loop exit
PB: predicated region body
PF: predicated region fallthrough
CT: control target
= control target key end

     0   :  { %v79_v1 = vmov 0   ;;  %s122_s0 = inlined_call_operand.vmem [shape: f32[1,128], index: 0, kind: input, shape index: {}]   ;;  %s123_s1 = inlined_call_operand.vmem [shape: f32[4,1], index: 1, kind: input, shape index: {}]   ;;  %s124_s2 = inlined_call_operand.vmem [shape: f32[4,1], index: 2, kind: input, shape index: {}]   ;;  %s125_s3 = inlined_call_operand.hbm [shape: f32[4,128], index: 3, kind: output, shape index: {}]  }
   0x1   :  { %v15_v0 = vld [vmem:[%s123_s1] sm:$0xf]  ;;  %54 = vset.pattern.permute.xlu0 %v79_v1 }
   0x2   :  { %8 = vsyncpa [#allocation3], 0  ;;  %19 = vperm.xlu0 %54, %v15_v0   ;;  %v29_v2 = vld [vmem:[%s124_s2] sm:$0xf]  ;;  %s80_s18 = smov [#allocation2]  }
   0x3   :  { %v51_v3 = vld [vmem:[%s122_s0] ss:$0 sm:$0xff]  ;;  %s43_s19 = sshll.u32 %s80_s18, 4  ;;  %s44_s19 = int_to_ptr.vmem [resolvable:$true] %s43_s19 }
   0x4   :  { %s55_s1 = scalar_lea.vmem %s44_s19, 64  ;;  %p60_p1 = scmp.lt.s32.totalorder %s44_s19, %s44_s19 }
   0x5   :  { %p56_p0 = scmp.ne.s32.totalorder %s44_s19, %s55_s1  ;;  %p61_p2 = scmp.lt.s32.totalorder %s55_s1, %s55_s1 }
   0x6   :  { %32 = vperm.xlu0 %54, %v29_v2  }
   0x7   :  { %p62_p3 = por %p61_p2, %p60_p1 }
   0x9   :  { %p63_p4 = pnand %p62_p3, %p56_p0 }
  0x81   :  { %v20_v4 = vpop.permute.xlu0 %19 }
  0x82   :  { %v28_v5 = vmul.f32 %v51_v3, %v20_v4 }
  0x85   :  { %v33_v6 = vpop.permute.xlu0 %32 }
  0x86   :  { %v35_v7 = vadd.f32 %v33_v6, %v28_v5 }
  0x88   :  { %36 = vst [vmem:[#allocation2] sm:$0xf] %v35_v7 }
  0x89   :  { %66 = shalt.err (!%p63_p4)
}
  0x8a   :  { %s67_s21 = scalar_lea.hbm %s125_s3, 64 }
  0x8b   :  { %p68_p5 = scmp.ne.s32.totalorder %s125_s3, %s67_s21  ;;  %p71_p6 = scmp.lt.u32.totalorder %s67_s21, %s125_s3 }
  0x8d   :  { %p73_p7 = pnand %p71_p6, %p68_p5 }
  0x8f   :  { %76 = shalt.err (!%p73_p7)
}
  0x90   :  { %46 = dma.vmem_to_hbm [thread:$0]  %s44_s19, 64, %s125_s3, [#allocation3]  }
  0x91   :  { %77 = dma.done.wait [#allocation3], 64  }
  0x92   :  { %78 = vsyncadd [#allocation3], 4294967232 }
  0x93   :  { %50 = vsyncpa [#allocation3], 1 }

</bundles_post_ra>
